<compile_context>
chip_gen: v7x
topology: tpu7x:2x2x1
jax: 0.10.0
libtpu: 0.0.40
codegen_flags: <defaults>
</compile_context>

<pallas_src>
import jax
import jax.numpy as jnp
from jax.experimental import pallas as pl
from jax.experimental.pallas import tpu as pltpu


def _round_up(x, m):
    return ((x + m - 1) // m) * m


def _critic_kernel(sa_ref, w12_ref, b12_ref, w3_ref, b3_ref, w4_ref, b4_ref,
                   out_ref):
    # fused fc1/fc2:  z = relu(concat(s, a) @ W12 + b12)      [TB, 2*H1P]
    z = jnp.dot(sa_ref[...], w12_ref[...], preferred_element_type=jnp.float32)
    z = jnp.maximum(z + b12_ref[...], 0.0).astype(w3_ref.dtype)
    # fc3:            h = relu(z @ W3 + b3)                    [TB, H2P]
    h = jnp.dot(z, w3_ref[...], preferred_element_type=jnp.float32)
    h = jnp.maximum(h + b3_ref[...], 0.0).astype(w4_ref.dtype)
    # fc4 (N padded to 128 for a lane-dense store; column 0 is the real q)
    q = jnp.dot(h, w4_ref[...], preferred_element_type=jnp.float32) + b4_ref[...]
    out_ref[...] = q.astype(out_ref.dtype)


@jax.jit
def critic_forward(state, action, prep):
    """Q(s, a) via a single batch-tiled Pallas kernel.

    state: [n, S] f32, action: [n, A] f32, prep: prepared/padded bf16 params.
    Returns [n, 1] f32.
    """
    w12, b12, w3, b3, w4, b4 = prep
    n = state.shape[0]

    sa = jnp.concatenate(
        [state.astype(jnp.float32), action.astype(jnp.float32)], axis=1
    ).astype(jnp.bfloat16)

    # Batch tile: 256 rows for training-size batches (fits every generation's
    # VMEM budget comfortably, incl. v7x's 64 MiB), otherwise pad to 8 rows.
    tb = 256 if n >= 256 else _round_up(max(n, 1), 8)
    n_pad = _round_up(n, tb)
    if n_pad != n:
        sa = jnp.pad(sa, ((0, n_pad - n), (0, 0)))

    sa_dim = sa.shape[1]          # S + A
    h12 = w12.shape[1]            # 2 * H1P (padded, lane multiple)
    h2p = w3.shape[1]             # H2P (padded, lane multiple)
    grid = (n_pad // tb,)

    out = pl.pallas_call(
        _critic_kernel,
        out_shape=jax.ShapeDtypeStruct((n_pad, 128), jnp.float32),
        grid_spec=pltpu.PrefetchScalarGridSpec(
            num_scalar_prefetch=0,
            grid=grid,
            in_specs=[
                pl.BlockSpec((tb, sa_dim), lambda i: (i, 0)),      # inputs tile
                pl.BlockSpec((sa_dim, h12), lambda i: (0, 0)),     # W12 resident
                pl.BlockSpec((1, h12), lambda i: (0, 0)),          # b12
                pl.BlockSpec((h12, h2p), lambda i: (0, 0)),        # W3 resident
                pl.BlockSpec((1, h2p), lambda i: (0, 0)),          # b3
                pl.BlockSpec((h2p, 128), lambda i: (0, 0)),        # W4 resident
                pl.BlockSpec((1, 128), lambda i: (0, 0)),          # b4
            ],
            out_specs=pl.BlockSpec((tb, 128), lambda i: (i, 0)),
        ),
        compiler_params=pltpu.CompilerParams(
            dimension_semantics=("parallel",)),
    )(sa, w12, b12, w3, b3, w4, b4)

    return out[:n, :1]


def init_critic_params(key, state_dim, action_dim, h1=200, h2=300):
    """nn.Linear-style init U(-1/sqrt(in), 1/sqrt(in)); weights stored (in, out)."""
    def linear(k, fan_in, fan_out):
        kw, kb = jax.random.split(k)
        bound = 1.0 / jnp.sqrt(fan_in)
        w = jax.random.uniform(kw, (fan_in, fan_out), jnp.float32, -bound, bound)
        b = jax.random.uniform(kb, (fan_out,), jnp.float32, -bound, bound)
        return w, b

    k1, k2, k3, k4 = jax.random.split(key, 4)
    w1, b1 = linear(k1, state_dim, h1)
    w2, b2 = linear(k2, action_dim, h1)
    w3, b3 = linear(k3, 2 * h1, h2)
    w4, b4 = linear(k4, h2, 1)
    return (w1, b1, w2, b2, w3, b3, w4, b4)


def prepare_critic_params(params, h1=200, h2=300):
    """One-time preprocessing: fuse fc1/fc2, pad hidden dims to lane multiples,
    pad fc4 to 128 output lanes, cast weights to bf16 (biases stay f32)."""
    w1, b1, w2, b2, w3, b3, w4, b4 = params
    s_dim, a_dim = w1.shape[0], w2.shape[0]
    h1p = _round_up(h1, 128)            # 200 -> 256
    h2p = _round_up(h2, 128)            # 300 -> 384

    # Block-diagonal fused fc1/fc2 weight: concat(s, a) @ W12 == [fc1(s) | fc2(a)]
    w12 = jnp.zeros((s_dim + a_dim, 2 * h1p), jnp.float32)
    w12 = w12.at[:s_dim, :h1].set(w1)
    w12 = w12.at[s_dim:, h1p:h1p + h1].set(w2)
    b12 = jnp.zeros((1, 2 * h1p), jnp.float32)
    b12 = b12.at[0, :h1].set(b1)
    b12 = b12.at[0, h1p:h1p + h1].set(b2)        # padded lanes stay exactly 0

    # fc3 weight laid out to match the padded [x | y] activation layout.
    w3p = jnp.zeros((2 * h1p, h2p), jnp.float32)
    w3p = w3p.at[:h1, :h2].set(w3[:h1])
    w3p = w3p.at[h1p:h1p + h1, :h2].set(w3[h1:])
    b3p = jnp.zeros((1, h2p), jnp.float32).at[0, :h2].set(b3)

    # fc4 padded to 128 output lanes; only column 0 is real.
    w4p = jnp.zeros((h2p, 128), jnp.float32).at[:h2, 0:1].set(w4)
    b4p = jnp.zeros((1, 128), jnp.float32).at[0, 0].set(b4[0])

    return (w12.astype(jnp.bfloat16), b12,
            w3p.astype(jnp.bfloat16), b3p,
            w4p.astype(jnp.bfloat16), b4p)


def critic_forward_ref(state, action, params):
    """Pure-JAX f32 reference matching the original PyTorch module."""
    w1, b1, w2, b2, w3, b3, w4, b4 = params
    x = jax.nn.relu(state @ w1 + b1)
    y = jax.nn.relu(action @ w2 + b2)
    h = jnp.concatenate([x, y], axis=1)
    h = jax.nn.relu(h @ w3 + b3)
    return h @ w4 + b4


def critic_forward_prep_ref(state, action, prep):
    """Pure-JAX reference mirroring the kernel's padding/bf16 math exactly."""
    w12, b12, w3, b3, w4, b4 = prep
    sa = jnp.concatenate([state, action], axis=1).astype(jnp.bfloat16)
    z = jnp.maximum(
        jnp.dot(sa, w12, preferred_element_type=jnp.float32) + b12, 0.0)
    h = jnp.maximum(
        jnp.dot(z.astype(jnp.bfloat16), w3,
                preferred_element_type=jnp.float32) + b3, 0.0)
    q = jnp.dot(h.astype(jnp.bfloat16), w4,
                preferred_element_type=jnp.float32) + b4
    return q[:, :1]


if __name__ == "__main__":
    key = jax.random.PRNGKey(0)
    k_p, k_s, k_a = jax.random.split(key, 3)

    batch, state_dim, action_dim = 2, 8, 4
    params = init_critic_params(k_p, state_dim, action_dim, h1=200, h2=300)
    prep = prepare_critic_params(params, h1=200, h2=300)

    state = jax.random.normal(k_s, (batch, state_dim), jnp.float32)
    action = jax.random.normal(k_a, (batch, action_dim), jnp.float32)

    q = critic_forward(state, action, prep)
    q = jax.block_until_ready(q)
    assert q.shape == (batch, 1), q.shape

    # Tight check: identical bf16/padded math in pure JAX (kernel correctness).
    q_prep_ref = critic_forward_prep_ref(state, action, prep)
    assert jnp.allclose(q, q_prep_ref, atol=1e-4, rtol=1e-4), (q, q_prep_ref)

    # End-to-end check vs. the original f32 formulation (bf16 quantization slack).
    q_ref = critic_forward_ref(state, action, params)
    assert jnp.allclose(q, q_ref, atol=2e-2, rtol=2e-2), (q, q_ref)

    print("KERNEL_OK")
</pallas_src>

<mosaic_0001>
module attributes {stable_mosaic.version = 11 : i64} {
  func.func @_critic_kernel(%arg0: i32, %arg1: memref<8x12xbf16, #tpu.memory_space<vmem>>, %arg2: memref<12x512xbf16, #tpu.memory_space<vmem>>, %arg3: memref<1x512xf32, #tpu.memory_space<vmem>>, %arg4: memref<512x384xbf16, #tpu.memory_space<vmem>>, %arg5: memref<1x384xf32, #tpu.memory_space<vmem>>, %arg6: memref<384x128xbf16, #tpu.memory_space<vmem>>, %arg7: memref<1x128xf32, #tpu.memory_space<vmem>>, %arg8: memref<8x128xf32, #tpu.memory_space<vmem>>) attributes {dimension_semantics = [#tpu.dimension_semantics<parallel>], iteration_bounds = array<i64: 1>, scalar_prefetch = 0 : i64, scratch_operands = 0 : i64, tpu.core_type = #tpu.core_type<tc>, window_params = [{transform_indices = @transform_0, window_bounds = array<i64: 8, 12>}, {pipeline_mode = #tpu.pipeline_mode<synchronous>, transform_indices = @transform_1, window_bounds = array<i64: 12, 512>}, {pipeline_mode = #tpu.pipeline_mode<synchronous>, transform_indices = @transform_2, window_bounds = array<i64: 1, 512>}, {pipeline_mode = #tpu.pipeline_mode<synchronous>, transform_indices = @transform_3, window_bounds = array<i64: 512, 384>}, {pipeline_mode = #tpu.pipeline_mode<synchronous>, transform_indices = @transform_4, window_bounds = array<i64: 1, 384>}, {pipeline_mode = #tpu.pipeline_mode<synchronous>, transform_indices = @transform_5, window_bounds = array<i64: 384, 128>}, {pipeline_mode = #tpu.pipeline_mode<synchronous>, transform_indices = @transform_6, window_bounds = array<i64: 1, 128>}, {transform_indices = @transform_7, window_bounds = array<i64: 8, 128>}]} {
    %c0 = arith.constant 0 : index
    %c0_0 = arith.constant 0 : index
    %0 = vector.load %arg1[%c0, %c0_0] : memref<8x12xbf16, #tpu.memory_space<vmem>>, vector<8x12xbf16>
    %c0_1 = arith.constant 0 : index
    %c0_2 = arith.constant 0 : index
    %1 = vector.load %arg2[%c0_1, %c0_2] : memref<12x512xbf16, #tpu.memory_space<vmem>>, vector<12x512xbf16>
    %cst = arith.constant dense<0.000000e+00> : vector<8x512xf32>
    %2 = tpu.matmul %0, %1, %cst {dimension_numbers = #tpu.dot_dimension_numbers<[1], [0], [0], [1], [0, 0, 1, 1], [], []>} : vector<8x12xbf16>, vector<12x512xbf16>, vector<8x512xf32> -> vector<8x512xf32>
    %c0_3 = arith.constant 0 : index
    %c0_4 = arith.constant 0 : index
    %3 = vector.load %arg3[%c0_3, %c0_4] : memref<1x512xf32, #tpu.memory_space<vmem>>, vector<1x512xf32>
    %4 = vector.broadcast %3 : vector<1x512xf32> to vector<8x512xf32>
    %5 = arith.addf %2, %4 : vector<8x512xf32>
    %cst_5 = arith.constant 0.000000e+00 : f32
    %6 = vector.broadcast %cst_5 : f32 to vector<8x512xf32>
    %7 = arith.maximumf %5, %6 : vector<8x512xf32>
    %8 = arith.truncf %7 : vector<8x512xf32> to vector<8x512xbf16>
    %c0_6 = arith.constant 0 : index
    %c0_7 = arith.constant 0 : index
    %9 = vector.load %arg4[%c0_6, %c0_7] : memref<512x384xbf16, #tpu.memory_space<vmem>>, vector<512x384xbf16>
    %cst_8 = arith.constant dense<0.000000e+00> : vector<8x384xf32>
    %10 = tpu.matmul %8, %9, %cst_8 {dimension_numbers = #tpu.dot_dimension_numbers<[1], [0], [0], [1], [0, 0, 1, 1], [], []>} : vector<8x512xbf16>, vector<512x384xbf16>, vector<8x384xf32> -> vector<8x384xf32>
    %c0_9 = arith.constant 0 : index
    %c0_10 = arith.constant 0 : index
    %11 = vector.load %arg5[%c0_9, %c0_10] : memref<1x384xf32, #tpu.memory_space<vmem>>, vector<1x384xf32>
    %12 = vector.broadcast %11 : vector<1x384xf32> to vector<8x384xf32>
    %13 = arith.addf %10, %12 : vector<8x384xf32>
    %cst_11 = arith.constant 0.000000e+00 : f32
    %14 = vector.broadcast %cst_11 : f32 to vector<8x384xf32>
    %15 = arith.maximumf %13, %14 : vector<8x384xf32>
    %16 = arith.truncf %15 : vector<8x384xf32> to vector<8x384xbf16>
    %c0_12 = arith.constant 0 : index
    %c0_13 = arith.constant 0 : index
    %17 = vector.load %arg6[%c0_12, %c0_13] : memref<384x128xbf16, #tpu.memory_space<vmem>>, vector<384x128xbf16>
    %cst_14 = arith.constant dense<0.000000e+00> : vector<8x128xf32>
    %18 = tpu.matmul %16, %17, %cst_14 {dimension_numbers = #tpu.dot_dimension_numbers<[1], [0], [0], [1], [0, 0, 1, 1], [], []>} : vector<8x384xbf16>, vector<384x128xbf16>, vector<8x128xf32> -> vector<8x128xf32>
    %c0_15 = arith.constant 0 : index
    %c0_16 = arith.constant 0 : index
    %19 = vector.load %arg7[%c0_15, %c0_16] : memref<1x128xf32, #tpu.memory_space<vmem>>, vector<1x128xf32>
    %20 = vector.broadcast %19 : vector<1x128xf32> to vector<8x128xf32>
    %21 = arith.addf %18, %20 : vector<8x128xf32>
    %c0_17 = arith.constant 0 : index
    %c0_18 = arith.constant 0 : index
    %22 = vector.load %arg8[%c0_17, %c0_18] : memref<8x128xf32, #tpu.memory_space<vmem>>, vector<8x128xf32>
    tpu.vector_store %arg8[%c0_17, %c0_18], %21 {strides = array<i32>} : memref<8x128xf32, #tpu.memory_space<vmem>>, vector<8x128xf32>,
    return
  }
  func.func @transform_0(%arg0: i32) -> (i32, i32) {
    %c0_i32 = arith.constant 0 : i32
    %c0_i32_0 = arith.constant 0 : i32
    return %arg0, %c0_i32 : i32, i32
  }
  func.func @transform_1(%arg0: i32) -> (i32, i32) {
    %c0_i32 = arith.constant 0 : i32
    %c0_i32_0 = arith.constant 0 : i32
    %c0_i32_1 = arith.constant 0 : i32
    return %c0_i32, %c0_i32_0 : i32, i32
  }
  func.func @transform_2(%arg0: i32) -> (i32, i32) {
    %c0_i32 = arith.constant 0 : i32
    %c0_i32_0 = arith.constant 0 : i32
    %c0_i32_1 = arith.constant 0 : i32
    return %c0_i32, %c0_i32_0 : i32, i32
  }
  func.func @transform_3(%arg0: i32) -> (i32, i32) {
    %c0_i32 = arith.constant 0 : i32
    %c0_i32_0 = arith.constant 0 : i32
    %c0_i32_1 = arith.constant 0 : i32
    return %c0_i32, %c0_i32_0 : i32, i32
  }
  func.func @transform_4(%arg0: i32) -> (i32, i32) {
    %c0_i32 = arith.constant 0 : i32
    %c0_i32_0 = arith.constant 0 : i32
    %c0_i32_1 = arith.constant 0 : i32
    return %c0_i32, %c0_i32_0 : i32, i32
  }
  func.func @transform_5(%arg0: i32) -> (i32, i32) {
    %c0_i32 = arith.constant 0 : i32
    %c0_i32_0 = arith.constant 0 : i32
    %c0_i32_1 = arith.constant 0 : i32
    return %c0_i32, %c0_i32_0 : i32, i32
  }
  func.func @transform_6(%arg0: i32) -> (i32, i32) {
    %c0_i32 = arith.constant 0 : i32
    %c0_i32_0 = arith.constant 0 : i32
    %c0_i32_1 = arith.constant 0 : i32
    return %c0_i32, %c0_i32_0 : i32, i32
  }
  func.func @transform_7(%arg0: i32) -> (i32, i32) {
    %c0_i32 = arith.constant 0 : i32
    %c0_i32_0 = arith.constant 0 : i32
    return %arg0, %c0_i32 : i32, i32
  }
}

</mosaic_0001>

<bundles_post_ra>
// kernel: critic_forward.1
= control target key start
LH: loop header
LB: loop body
LE: loop exit
PB: predicated region body
PF: predicated region fallthrough
CT: control target
= control target key end

     0   :  { %12 = vsyncpa [#allocation3], 0  ;;  %s1929_s0 = inlined_call_operand.vmem [shape: bf16[8,12], index: 0, kind: input, shape index: {}]   ;;  %s1930_s1 = inlined_call_operand.hbm [shape: bf16[12,512], index: 1, kind: input, shape index: {}]   ;;  %s1931_s2 = inlined_call_operand.vmem [shape: f32[1,512], index: 2, kind: input, shape index: {}]   ;;  %s1932_s3 = inlined_call_operand.hbm [shape: bf16[512,384], index: 3, kind: input, shape index: {}]   ;;  %s1933_s4 = inlined_call_operand.vmem [shape: f32[1,384], index: 4, kind: input, shape index: {}]   ;;  %s1934_s5 = inlined_call_operand.hbm [shape: bf16[384,128], index: 5, kind: input, shape index: {}]   ;;  %s1935_s6 = inlined_call_operand.vmem [shape: f32[1,128], index: 6, kind: input, shape index: {}]   ;;  %s1936_s7 = inlined_call_operand.vmem [shape: f32[8,128], index: 7, kind: output, shape index: {}]  }
   0x1   :  { %13 = vsyncpa [#allocation5], 0  ;;  %s1799_s24 = smov [#allocation4]   ;;  %s1729_s28 = scalar_lea.hbm %s1932_s3, 12288 }
   0x2   :  { %s35_s25 = sshll.u32 %s1799_s24, 4  ;;  %p1730_p0 = scmp.ne.s32.totalorder %s1932_s3, %s1729_s28  ;;  %s36_s25 = int_to_ptr.vmem [resolvable:$true] %s35_s25 }
   0x3   :  { %p1733_p1 = scmp.lt.u32.totalorder %s1729_s28, %s1932_s3 }
   0x5   :  { %p1735_p2 = pnand %p1733_p1, %p1730_p0 }
   0x7   :  { %1738 = shalt.err (!%p1735_p2)
}
   0x8   :  { %s1739_s10 = scalar_lea.vmem %s36_s25, 12288  ;;  %p1744_p4 = scmp.lt.s32.totalorder %s36_s25, %s36_s25 }
   0x9   :  { %p1740_p3 = scmp.ne.s32.totalorder %s36_s25, %s1739_s10  ;;  %p1745_p5 = scmp.lt.s32.totalorder %s1739_s10, %s1739_s10 }
   0xb   :  { %p1746_p6 = por %p1745_p5, %p1744_p4 }
   0xd   :  { %p1747_p7 = pnand %p1746_p6, %p1740_p3 }
   0xf   :  { %1750 = shalt.err (!%p1747_p7)
}
  0x10   :  { %s1800_s11 = smov 192   ;;  %s1801_s12 = smov 12  }
  0x11   :  { %41 = dma.hbm_to_vmem [thread:$0]  %s1932_s3, 12288, %s36_s25, [#allocation5], %s1800_s11, %s1800_s11, %s1801_s12  }
  0x12   :  { %s1802_s15 = smov [#allocation2]   ;;  %s1751_s19 = scalar_lea.hbm %s1930_s1, 512 }
  0x13   :  { %s21_s16 = sshll.u32 %s1802_s15, 4  ;;  %p1752_p8 = scmp.ne.s32.totalorder %s1930_s1, %s1751_s19  ;;  %s22_s16 = int_to_ptr.vmem [resolvable:$true] %s21_s16 }
  0x14   :  { %p1755_p9 = scmp.lt.u32.totalorder %s1751_s19, %s1930_s1 }
  0x16   :  { %p1757_p10 = pnand %p1755_p9, %p1752_p8 }
  0x18   :  { %1760 = shalt.err (!%p1757_p10)
}
  0x19   :  { %s1761_s24 = scalar_lea.vmem %s22_s16, 512  ;;  %p1766_p12 = scmp.lt.s32.totalorder %s22_s16, %s22_s16 }
  0x1a   :  { %p1762_p11 = scmp.ne.s32.totalorder %s22_s16, %s1761_s24  ;;  %p1767_p13 = scmp.lt.s32.totalorder %s1761_s24, %s1761_s24 }
  0x1c   :  { %p1768_p0 = por %p1767_p13, %p1766_p12 }
  0x1e   :  { %p1769_p1 = pnand %p1768_p0, %p1762_p11 }
  0x20   :  { %1772 = shalt.err (!%p1769_p1)
}
  0x21   :  { %s1803_s3 = smov 256   ;;  %s1804_s25 = smov 16  }
  0x22   :  { %27 = dma.hbm_to_vmem [thread:$0]  %s1930_s1, 512, %s22_s16, [#allocation3], %s1803_s3, %s1803_s3, %s1804_s25  }
  0x23   :  { %s1805_s28 = smov [#allocation6]   ;;  %s1773_s9 = scalar_lea.hbm %s1934_s5, 3072 }
  0x24   :  { %s49_s29 = sshll.u32 %s1805_s28, 4  ;;  %p1774_p2 = scmp.ne.s32.totalorder %s1934_s5, %s1773_s9  ;;  %s50_s29 = int_to_ptr.vmem [resolvable:$true] %s49_s29 }
  0x25   :  { %p1777_p3 = scmp.lt.u32.totalorder %s1773_s9, %s1934_s5 }
  0x27   :  { %p1779_p4 = pnand %p1777_p3, %p1774_p2 }
  0x29   :  { %1782 = shalt.err (!%p1779_p4)
}
  0x2a   :  { %s1783_s14 = scalar_lea.vmem %s50_s29, 3072  ;;  %p1788_p6 = scmp.lt.s32.totalorder %s50_s29, %s50_s29 }
  0x2b   :  { %p1784_p5 = scmp.ne.s32.totalorder %s50_s29, %s1783_s14  ;;  %p1789_p7 = scmp.lt.s32.totalorder %s1783_s14, %s1783_s14 }
  0x2d   :  { %p1790_p8 = por %p1789_p7, %p1788_p6 }
  0x2f   :  { %p1791_p9 = pnand %p1790_p8, %p1784_p5 }
  0x31   :  { %1794 = shalt.err (!%p1791_p9)
}
  0x32   :  { %s1806_s1 = smov 64   ;;  %s1807_s15 = smov 4  }
  0x33   :  { %55 = dma.hbm_to_vmem [thread:$0]  %s1934_s5, 3072, %s50_s29, [#allocation5], %s1806_s1, %s1806_s1, %s1807_s15  }
  0x34   :  { %1795 = dma.done.wait [#allocation3], 512  }
  0x35   :  { %1796 = vsyncadd [#allocation3], 4294966784 }
  0x36   :  { %1797 = dma.done.wait [#allocation5], 15360  }
  0x37   :  { %1798 = vsyncadd [#allocation5], 4294951936  ;;  %v1808_v0 = vmov 0   ;;  %vm115_vm0 = vcmask 1045504   ;;  %v68_v3 = vld [vmem:[%s1929_s0] sm:$0xf]  ;;  %v75_v58 = vlaneseq }
  0x38   :  { %160 = vmatprep.mubr.bf16.mxu0 %v1808_v0  ;;  %201 = vmatprep.mubr.bf16.mxu1 %v1808_v0  ;;  %v1571_v1 = vld [vmem:[#allocation2 + $0x4] ss:$16 sps:$4 sm:$0x3f]   ;;  %v1573_v2 = vld [vmem:[#allocation2] ss:$16 sps:$4 sm:$0x3f]  }
  0x39   :  { %1333 = vmatprep.subr.msk.bf16.mxu0 %vm115_vm0, %v1571_v1  ;;  %v1574_v4 = vld [vmem:[#allocation2 + $0xc] ss:$16 sps:$4 sm:$0x3f]   ;;  %v117_v5 = vsel %vm115_vm0, %v1573_v2, 0  ;;  %vm111_vm1 = vcmask 97280   ;;  %v1890_v59 = vshrl.u32 %v75_v58, 7 }
  0x3a   :  { %v1576_v6 = vld [vmem:[#allocation2 + $0x8] ss:$16 sps:$4 sm:$0x3f]   ;;  %129 = vmatpush1.bf16.msra.mxu0 %v117_v5  ;;  %1335 = vmatprep.subr.msk.bf16.mxu1 %vm115_vm0, %v1574_v4  ;;  %v1577_v7 = vld [vmem:[#allocation4] ss:$12 sps:$4 sm:$0xff]   ;;  %vm1810_vm2 = vmmov 0  }
  0x3b   :  { %v1579_v8 = vld [vmem:[#allocation4 + $0x4] ss:$12 sps:$4 sm:$0xff]   ;;  %v123_v9 = vsel %vm115_vm0, %v1576_v6, 0  ;;  %v1582_v10 = vld [vmem:[#allocation4 + $0x1c] ss:$12 sps:$4 sm:$0xff]   ;;  %v77_v60 = vsub.s32 0, %v1890_v59 }
  0x3c   :  { %170 = vmatpush1.bf16.msra.mxu1 %v123_v9  ;;  %875 = vmatprep.subr.bf16.mxu0 %v1579_v8  ;;  %v1580_v11 = vld [vmem:[#allocation4 + $0x18] ss:$12 sps:$4 sm:$0xff]   ;;  %v1585_v12 = vld [vmem:[#allocation4 + $0x34] ss:$12 sps:$4 sm:$0xff]   ;;  %v1583_v13 = vld [vmem:[#allocation4 + $0x30] ss:$12 sps:$4 sm:$0xff]  }
  0x3d   :  { %1334 = vmatmul.mubr.msk.bf16.vlgmr.msra.gmra.mrb[0].mxu0 %vm111_vm1, %v68_v3  ;;  %v1588_v14 = vld [vmem:[#allocation4 + $0x4c] ss:$12 sps:$4 sm:$0xff]   ;;  %v1586_v15 = vld [vmem:[#allocation4 + $0x48] ss:$12 sps:$4 sm:$0xff]   ;;  %v1591_v18 = vld [vmem:[#allocation4 + $0x64] ss:$12 sps:$4 sm:$0xff]  }
  0x3e   :  { %876 = vmatpush1.bf16.msra.mxu0 %v1577_v7  ;;  %v1604_v16 = vld [vmem:[#allocation4 + $0xc8] ss:$12 sps:$4 sm:$0xff]   ;;  %v1589_v19 = vld [vmem:[#allocation4 + $0x60] ss:$12 sps:$4 sm:$0xff]   ;;  %v1614_v23 = vld [vmem:[#allocation4 + $0xf8] ss:$12 sps:$4 sm:$0xff]  }
  0x3f   :  { %1336 = vmatmul.mubr.msk.bf16.vlgmr.msra.gmra.mrb[0].mxu1 %vm111_vm1, %v68_v3  ;;  %877 = vmatprep.subr.bf16.mxu0 %v1582_v10  ;;  %v1605_v17 = vld [vmem:[#allocation4 + $0x8] ss:$12 sps:$4 sm:$0xff]   ;;  %v1609_v20 = vld [vmem:[#allocation4 + $0xe0] ss:$12 sps:$4 sm:$0xff]   ;;  %v1615_v24 = vld [vmem:[#allocation4 + $0x38] ss:$12 sps:$4 sm:$0xff]  }
  0x40   :  { %1458 = vmatprep.subr.bf16.mxu1 %v1604_v16  ;;  %v1610_v21 = vld [vmem:[#allocation4 + $0x20] ss:$12 sps:$4 sm:$0xff]   ;;  %v1594_v22 = vld [vmem:[#allocation4 + $0x7c] ss:$12 sps:$4 sm:$0xff]   ;;  %v1592_v25 = vld [vmem:[#allocation4 + $0x78] ss:$12 sps:$4 sm:$0xff]  }
  0x41   :  { %1459 = vmatpush3.bf16.msra.mxu1 %v1605_v17  ;;  %v1597_v26 = vld [vmem:[#allocation4 + $0x94] ss:$12 sps:$4 sm:$0xff]   ;;  %v1619_v27 = vld [vmem:[#allocation4 + $0x110] ss:$12 sps:$4 sm:$0xff]   ;;  %v1600_v30 = vld [vmem:[#allocation4 + $0xac] ss:$12 sps:$4 sm:$0xff]  }
  0x42   :  { %878 = vmatpush1.bf16.msra.mxu0 %v1580_v11  ;;  %1460 = vmatprep.subr.bf16.mxu1 %v1609_v20  ;;  %v1620_v28 = vld [vmem:[#allocation4 + $0x50] ss:$12 sps:$4 sm:$0xff]   ;;  %v1624_v31 = vld [vmem:[#allocation4 + $0x128] ss:$12 sps:$4 sm:$0xff]   ;;  %v1629_v34 = vld [vmem:[#allocation4 + $0x140] ss:$12 sps:$4 sm:$0xff]  }
  0x43   :  { %879 = vmatprep.subr.bf16.mxu0 %v1585_v12  ;;  %v1595_v29 = vld [vmem:[#allocation4 + $0x90] ss:$12 sps:$4 sm:$0xff]   ;;  %v1625_v32 = vld [vmem:[#allocation4 + $0x68] ss:$12 sps:$4 sm:$0xff]   ;;  %v1630_v36 = vld [vmem:[#allocation4 + $0x80] ss:$12 sps:$4 sm:$0xff]  }
  0x44   :  { %v1598_v33 = vld [vmem:[#allocation4 + $0xa8] ss:$12 sps:$4 sm:$0xff]   ;;  %v1603_v35 = vld [vmem:[#allocation4 + $0xc4] ss:$12 sps:$4 sm:$0xff]   ;;  %v1601_v37 = vld [vmem:[#allocation4 + $0xc0] ss:$12 sps:$4 sm:$0xff]  }
  0x45   :  { %1461 = vmatpush3.bf16.msra.mxu1 %v1610_v21  ;;  %v1608_v38 = vld [vmem:[#allocation4 + $0xdc] ss:$12 sps:$4 sm:$0xff]   ;;  %v1606_v39 = vld [vmem:[#allocation4 + $0xd8] ss:$12 sps:$4 sm:$0xff]   ;;  %v1613_v40 = vld [vmem:[#allocation4 + $0xf4] ss:$12 sps:$4 sm:$0xff]  }
  0x46   :  { %880 = vmatpush1.bf16.msra.mxu0 %v1583_v13  ;;  %1462 = vmatprep.subr.bf16.mxu1 %v1614_v23  ;;  %v1611_v41 = vld [vmem:[#allocation4 + $0xf0] ss:$12 sps:$4 sm:$0xff]   ;;  %v1618_v42 = vld [vmem:[#allocation4 + $0x10c] ss:$12 sps:$4 sm:$0xff]   ;;  %v1616_v43 = vld [vmem:[#allocation4 + $0x108] ss:$12 sps:$4 sm:$0xff]  }
  0x47   :  { %881 = vmatprep.subr.bf16.mxu0 %v1588_v14  ;;  %v1623_v44 = vld [vmem:[#allocation4 + $0x124] ss:$12 sps:$4 sm:$0xff]   ;;  %v1621_v45 = vld [vmem:[#allocation4 + $0x120] ss:$12 sps:$4 sm:$0xff]   ;;  %v1628_v46 = vld [vmem:[#allocation4 + $0x13c] ss:$12 sps:$4 sm:$0xff]  }
  0x48   :  { %v1626_v47 = vld [vmem:[#allocation4 + $0x138] ss:$12 sps:$4 sm:$0xff]   ;;  %v1633_v48 = vld [vmem:[#allocation4 + $0x154] ss:$12 sps:$4 sm:$0xff]   ;;  %v1631_v50 = vld [vmem:[#allocation4 + $0x150] ss:$12 sps:$4 sm:$0xff]  }
  0x49   :  { %1463 = vmatpush3.bf16.msra.mxu1 %v1615_v24  ;;  %v1634_v49 = vld [vmem:[#allocation4 + $0x158] ss:$12 sps:$4 sm:$0xff]   ;;  %v1639_v53 = vld [vmem:[#allocation4 + $0x170] ss:$12 sps:$4 sm:$0xff]   ;;  %v1636_v54 = vld [vmem:[#allocation4 + $0x168] ss:$12 sps:$4 sm:$0xff]  }
  0x4a   :  { %882 = vmatpush1.bf16.msra.mxu0 %v1586_v15  ;;  %1464 = vmatprep.subr.bf16.mxu1 %v1619_v27  ;;  %v1635_v51 = vld [vmem:[#allocation4 + $0x98] ss:$12 sps:$4 sm:$0xff]   ;;  %v1640_v55 = vld [vmem:[#allocation4 + $0xb0] ss:$12 sps:$4 sm:$0xff]   ;;  %v1644_v57 = vld [vmem:[#allocation4 + $0x248] ss:$12 sps:$4 sm:$0xff]  }
  0x4b   :  { %883 = vmatprep.subr.bf16.mxu0 %v1591_v18  ;;  %v1638_v52 = vld [vmem:[#allocation4 + $0x16c] ss:$12 sps:$4 sm:$0xff]   ;;  %v1643_v56 = vld [vmem:[#allocation4 + $0x184] ss:$12 sps:$4 sm:$0xff]   ;;  %v1896_v61 = vld [vmem:[%s1931_s2] sm:$0xf] }
  0x4c   :  { %v81_v62 = vsub.s32 1, %v1890_v59  ;;  %v89_v63 = vsub.s32 3, %v1890_v59  ;;  %v78_v0 = vrot.slane %v1896_v61, %v77_v60  ;;  %v1641_v17 = vld [vmem:[#allocation4 + $0x180] ss:$12 sps:$4 sm:$0xff]   ;;  %v1645_v18 = vld [vmem:[#allocation4 + $0x188] ss:$12 sps:$4 sm:$0xff]  }
  0x4d   :  { %1465 = vmatpush3.bf16.msra.mxu1 %v1620_v28  ;;  %v1648_v21 = vld [vmem:[#allocation4 + $0x19c] ss:$12 sps:$4 sm:$0xff]   ;;  %v1646_v24 = vld [vmem:[#allocation4 + $0x198] ss:$12 sps:$4 sm:$0xff]  }
  0x4e   :  { %884 = vmatpush1.bf16.msra.mxu0 %v1589_v19  ;;  %1466 = vmatprep.subr.bf16.mxu1 %v1624_v31  ;;  %v82_v1 = vrot.slane %v1896_v61, %v81_v62  ;;  %v90_v3 = vrot.slane %v1896_v61, %v89_v63  ;;  %v1654_v27 = vld [vmem:[#allocation4 + $0x278] ss:$12 sps:$4 sm:$0xff]   ;;  %v1651_v28 = vld [vmem:[#allocation4 + $0x1b0] ss:$12 sps:$4 sm:$0xff]  }
  0x4f   :  { %885 = vmatprep.subr.bf16.mxu0 %v1594_v22  ;;  %v1649_v22 = vld [vmem:[#allocation4 + $0x260] ss:$12 sps:$4 sm:$0xff]   ;;  %v1659_v31 = vld [vmem:[#allocation4 + $0x290] ss:$12 sps:$4 sm:$0xff]   ;;  %v1684_v58 = vld [vmem:[#allocation4 + $0x258] ss:$12 sps:$4 sm:$0xff]  }
  0x50   :  { %v1687_v63 = vld [vmem:[#allocation4 + $0x270] ss:$12 sps:$4 sm:$0xff]  }
  0x51   :  { %1467 = vmatpush3.bf16.msra.mxu1 %v1625_v32  ;;  %v1656_v32 = vld [vmem:[#allocation4 + $0x1c8] ss:$12 sps:$4 sm:$0xff]  }
  0x52   :  { %886 = vmatpush1.bf16.msra.mxu0 %v1592_v25  ;;  %1468 = vmatprep.subr.bf16.mxu1 %v1629_v34  ;;  %v1650_v25 = vld [vmem:[#allocation4 + $0x1a0] ss:$12 sps:$4 sm:$0xff]   ;;  %v1663_v34 = vld [vmem:[#allocation4 + $0x1e4] ss:$12 sps:$4 sm:$0xff]  }
  0x53   :  { %887 = vmatprep.subr.bf16.mxu0 %v1597_v26  ;;  %v1653_v26 = vld [vmem:[#allocation4 + $0x1b4] ss:$12 sps:$4 sm:$0xff]  }
  0x55   :  { %1469 = vmatpush3.bf16.msra.mxu1 %v1630_v36  ;;  %v85_v36 = vsub.s32 2, %v1890_v59  ;;  %v1723_v59 = vld [vmem:[#allocation6 + $0x90] sm:$0xff]  }
  0x56   :  { %888 = vmatpush1.bf16.msra.mxu0 %v1595_v29  ;;  %1470 = vmatprep.subr.bf16.mxu1 %v1634_v49  ;;  %v1655_v29 = vld [vmem:[#allocation4 + $0x1b8] ss:$12 sps:$4 sm:$0xff]  }
  0x57   :  { %889 = vmatprep.subr.bf16.mxu0 %v1600_v30  ;;  %v1658_v30 = vld [vmem:[#allocation4 + $0x1cc] ss:$12 sps:$4 sm:$0xff]  }
  0x58   :  { %v1678_v49 = vld [vmem:[#allocation4 + $0x22c] ss:$12 sps:$4 sm:$0xff]  }
  0x59   :  { %1471 = vmatpush3.bf16.msra.mxu1 %v1635_v51 }
  0x5a   :  { %890 = vmatpush1.bf16.msra.mxu0 %v1598_v33  ;;  %1472 = vmatprep.subr.bf16.mxu1 %v1639_v53  ;;  %v1660_v33 = vld [vmem:[#allocation4 + $0x1d0] ss:$12 sps:$4 sm:$0xff]  }
  0x5b   :  { %891 = vmatprep.subr.bf16.mxu0 %v1603_v35  ;;  %v1664_v35 = vld [vmem:[#allocation4 + $0x2a8] ss:$12 sps:$4 sm:$0xff]   ;;  %v1680_v53 = vld [vmem:[#allocation4 + $0x230] ss:$12 sps:$4 sm:$0xff]  }
  0x5d   :  { %1473 = vmatpush3.bf16.msra.mxu1 %v1640_v55 }
  0x5e   :  { %892 = vmatpush1.bf16.msra.mxu0 %v1601_v37  ;;  %1480 = vmatprep.subr.bf16.mxu1 %v1644_v57  ;;  %v1661_v37 = vld [vmem:[#allocation4 + $0x1e0] ss:$12 sps:$4 sm:$0xff]   ;;  %v1686_v57 = vld [vmem:[#allocation4 + $0x25c] ss:$12 sps:$4 sm:$0xff]  }
  0x5f   :  { %893 = vmatprep.subr.bf16.mxu0 %v1608_v38  ;;  %v1665_v38 = vld [vmem:[#allocation4 + $0x1e8] ss:$12 sps:$4 sm:$0xff]  }
  0x62   :  { %894 = vmatpush1.bf16.msra.mxu0 %v1606_v39  ;;  %v1668_v39 = vld [vmem:[#allocation4 + $0x1fc] ss:$12 sps:$4 sm:$0xff]  }
  0x63   :  { %895 = vmatprep.subr.bf16.mxu0 %v1613_v40  ;;  %v1669_v40 = vld [vmem:[#allocation4 + $0x2c0] ss:$12 sps:$4 sm:$0xff]  }
  0x66   :  { %896 = vmatpush1.bf16.msra.mxu0 %v1611_v41  ;;  %v86_v41 = vrot.slane %v1896_v61, %v85_v36  ;;  %v1689_v61 = vld [vmem:[#allocation4 + $0x274] ss:$12 sps:$4 sm:$0xff]  }
  0x67   :  { %897 = vmatprep.subr.bf16.mxu0 %v1618_v42  ;;  %v1666_v42 = vld [vmem:[#allocation4 + $0x1f8] ss:$12 sps:$4 sm:$0xff]  }
  0x6a   :  { %898 = vmatpush1.bf16.msra.mxu0 %v1616_v43  ;;  %v1670_v43 = vld [vmem:[#allocation4 + $0x200] ss:$12 sps:$4 sm:$0xff]  }
  0x6b   :  { %899 = vmatprep.subr.bf16.mxu0 %v1623_v44  ;;  %v1673_v44 = vld [vmem:[#allocation4 + $0x214] ss:$12 sps:$4 sm:$0xff]  }
  0x6e   :  { %900 = vmatpush1.bf16.msra.mxu0 %v1621_v45  ;;  %v1674_v45 = vld [vmem:[#allocation4 + $0x2d8] ss:$12 sps:$4 sm:$0xff]  }
  0x6f   :  { %901 = vmatprep.subr.bf16.mxu0 %v1628_v46 }
  0x72   :  { %902 = vmatpush1.bf16.msra.mxu0 %v1626_v47  ;;  %v1671_v47 = vld [vmem:[#allocation4 + $0x210] ss:$12 sps:$4 sm:$0xff]  }
  0x73   :  { %903 = vmatprep.subr.bf16.mxu0 %v1633_v48  ;;  %v1675_v48 = vld [vmem:[#allocation4 + $0x218] ss:$12 sps:$4 sm:$0xff]  }
  0x76   :  { %904 = vmatpush1.bf16.msra.mxu0 %v1631_v50  ;;  %v1679_v50 = vld [vmem:[#allocation4 + $0x2f0] ss:$12 sps:$4 sm:$0xff]  }
  0x77   :  { %905 = vmatprep.subr.bf16.mxu0 %v1638_v52  ;;  %v1676_v52 = vld [vmem:[#allocation4 + $0x228] ss:$12 sps:$4 sm:$0xff]  }
  0x7a   :  { %906 = vmatpush1.bf16.msra.mxu0 %v1636_v54  ;;  %v1683_v54 = vld [vmem:[#allocation4 + $0x244] ss:$12 sps:$4 sm:$0xff]  }
  0x7b   :  { %916 = vmatprep.subr.bf16.mxu0 %v1643_v56  ;;  %v1681_v56 = vld [vmem:[#allocation4 + $0x240] ss:$12 sps:$4 sm:$0xff]  }
 0x110   :  { %v162_v2 = vpop.f32.mrb[0].mxu0 }
 0x111   :  { %v163_v4 = vadd.f32 %v162_v2, %v78_v0  ;;  %v164_v5 = vpop.f32.mrb[1].mxu0  ;;  %v1692_v0 = vld [vmem:[#allocation4 + $0x28c] ss:$12 sps:$4 sm:$0xff]   ;;  %v1695_v2 = vld [vmem:[#allocation4 + $0x2a4] ss:$12 sps:$4 sm:$0xff]  }
 0x112   :  { %v165_v6 = vadd.f32 %v164_v5, %v82_v1  ;;  %v166_v7 = vpop.f32.mrb[2].mxu0  ;;  %v1907_v8 = vpop.f32.mrb[0].mxu1  ;;  %v1690_v1 = vld [vmem:[#allocation4 + $0x288] ss:$12 sps:$4 sm:$0xff]   ;;  %v1696_v5 = vld [vmem:[#allocation4 + $0x2b8] ss:$12 sps:$4 sm:$0xff]  }
 0x113   :  { %v210_v9 = vmax.f32 %v163_v4, 0.0  ;;  %v167_v10 = vpop.f32.mrb[3].mxu0  ;;  %v205_v11 = vpop.f32.mrb[1].mxu1  ;;  %v204_v46 = vadd.f32 %v1907_v8, %v86_v41  ;;  %v1698_v4 = vld [vmem:[#allocation4 + $0x2bc] ss:$12 sps:$4 sm:$0xff]  }
 0x114   :  { %v211_v12 = vmax.f32 %v165_v6, 0.0  ;;  %v206_v13 = vadd.f32 %v205_v11, %v90_v3  ;;  %v207_v14 = vpop.f32.mrb[2].mxu1  ;;  %v1693_v3 = vld [vmem:[#allocation4 + $0x2a0] ss:$12 sps:$4 sm:$0xff]   ;;  %v1699_v7 = vld [vmem:[#allocation4 + $0x2d0] ss:$12 sps:$4 sm:$0xff]  }
 0x115   :  { %v208_v15 = vpop.f32.mrb[3].mxu1  ;;  %v214_v20 = vpack.c.bf16 %v210_v9, %v210_v9  ;;  %v212_v51 = vmax.f32 %v204_v46, 0.0  ;;  %v1701_v6 = vld [vmem:[#allocation4 + $0x2d4] ss:$12 sps:$4 sm:$0xff]   ;;  %v1704_v8 = vld [vmem:[#allocation4 + $0x2ec] ss:$12 sps:$4 sm:$0xff]  }
 0x116   :  { %v215_v16 = vpack.c.bf16 %v211_v12, %v211_v12  ;;  %v213_v19 = vmax.f32 %v206_v13, 0.0  ;;  %v1702_v9 = vld [vmem:[#allocation4 + $0x2e8] ss:$12 sps:$4 sm:$0xff]   ;;  %v1705_v10 = vld [vmem:[#allocation6 + $0x40] sm:$0xff]  }
 0x117   :  { %v216_v55 = vpack.c.bf16 %v212_v51, %v212_v51  ;;  %v1706_v11 = vld [vmem:[#allocation6] sm:$0xff]   ;;  %v1707_v12 = vld [vmem:[#allocation6 + $0x48] sm:$0xff]   ;;  %v1709_v14 = vld [vmem:[#allocation6 + $0x50] sm:$0xff]  }
 0x118   :  { %907 = vmatprep.mubr.bf16.mxu0 %v215_v16  ;;  %989 = vmatprep.mubr.bf16.mxu1 %v215_v16  ;;  %v217_v23 = vpack.c.bf16 %v213_v19, %v213_v19  ;;  %v1708_v13 = vld [vmem:[#allocation6 + $0x8] sm:$0xff]   ;;  %v1710_v15 = vld [vmem:[#allocation6 + $0x10] sm:$0xff]   ;;  %v1711_v16 = vld [vmem:[#allocation6 + $0x58] sm:$0xff]  }
 0x119   :  { %908 = vmatmul.mubr.bf16.vlgmr.msra.gmra.mrb[4].mxu0 %v214_v20  ;;  %990 = vmatmul.mubr.bf16.vlgmr.msra.gmra.mrb[4].mxu1 %v214_v20  ;;  %v1714_v19 = vld [vmem:[#allocation6 + $0x20] sm:$0xff]   ;;  %v1715_v20 = vld [vmem:[#allocation6 + $0x68] sm:$0xff]  }
 0x11a   :  { %917 = vmatpush1.bf16.msra.mxu0 %v1641_v17  ;;  %1481 = vmatpush3.bf16.msra.mxu1 %v1645_v18  ;;  %v1712_v17 = vld [vmem:[#allocation6 + $0x18] sm:$0xff]   ;;  %v1713_v18 = vld [vmem:[#allocation6 + $0x60] sm:$0xff]  }
 0x11b   :  { %918 = vmatprep.subr.bf16.mxu0 %v1648_v21  ;;  %1482 = vmatprep.subr.bf16.mxu1 %v1649_v22  ;;  %v1716_v21 = vld [vmem:[#allocation6 + $0x28] sm:$0xff]   ;;  %v1717_v22 = vld [vmem:[#allocation6 + $0x70] sm:$0xff]  }
 0x11c   :  { %1029 = vmatprep.mubr.bf16.mxu1 %v217_v23  ;;  %948 = vmatprep.mubr.bf16.mxu0 %v217_v23  ;;  %v1718_v23 = vld [vmem:[#allocation6 + $0x30] sm:$0xff]  }
 0x11e   :  { %919 = vmatpush1.bf16.msra.mxu0 %v1646_v24  ;;  %1483 = vmatpush3.bf16.msra.mxu1 %v1650_v25  ;;  %v1719_v24 = vld [vmem:[#allocation6 + $0x78] sm:$0xff]  }
 0x11f   :  { %920 = vmatprep.subr.bf16.mxu0 %v1653_v26  ;;  %1484 = vmatprep.subr.bf16.mxu1 %v1654_v27  ;;  %v1720_v25 = vld [vmem:[#allocation6 + $0x38] sm:$0xff]   ;;  %v1809_v26 = vmov 0.0  }
 0x122   :  { %921 = vmatpush1.bf16.msra.mxu0 %v1651_v28  ;;  %1485 = vmatpush3.bf16.msra.mxu1 %v1655_v29 }
 0x123   :  { %922 = vmatprep.subr.bf16.mxu0 %v1658_v30  ;;  %1486 = vmatprep.subr.bf16.mxu1 %v1659_v31 }
 0x126   :  { %923 = vmatpush1.bf16.msra.mxu0 %v1656_v32  ;;  %1487 = vmatpush3.bf16.msra.mxu1 %v1660_v33  ;;  %v346_v32 = vld [vmem:[%s1933_s4] sm:$0x7] }
 0x127   :  { %924 = vmatprep.subr.bf16.mxu0 %v1663_v34  ;;  %1488 = vmatprep.subr.bf16.mxu1 %v1664_v35  ;;  %v359_v33 = vrot.slane %v346_v32, %v85_v36 }
 0x12a   :  { %925 = vmatpush1.bf16.msra.mxu0 %v1661_v37  ;;  %1489 = vmatpush3.bf16.msra.mxu1 %v1665_v38 }
 0x12b   :  { %926 = vmatprep.subr.bf16.mxu0 %v1668_v39  ;;  %1490 = vmatprep.subr.bf16.mxu1 %v1669_v40 }
 0x12e   :  { %927 = vmatpush1.bf16.msra.mxu0 %v1666_v42  ;;  %1491 = vmatpush3.bf16.msra.mxu1 %v1670_v43  ;;  %v351_v42 = vrot.slane %v346_v32, %v77_v60  ;;  %v355_v43 = vrot.slane %v346_v32, %v81_v62  ;;  %v1724_v60 = vld [vmem:[#allocation6 + $0x98] sm:$0xff]   ;;  %v1725_v62 = vld [vmem:[#allocation6 + $0xa0] sm:$0xff]  }
 0x12f   :  { %928 = vmatprep.subr.bf16.mxu0 %v1673_v44  ;;  %1492 = vmatprep.subr.bf16.mxu1 %v1674_v45 }
 0x132   :  { %929 = vmatpush1.bf16.msra.mxu0 %v1671_v47  ;;  %1493 = vmatpush3.bf16.msra.mxu1 %v1675_v48 }
 0x133   :  { %930 = vmatprep.subr.bf16.mxu0 %v1678_v49  ;;  %1494 = vmatprep.subr.bf16.mxu1 %v1679_v50 }
 0x136   :  { %931 = vmatpush1.bf16.msra.mxu0 %v1676_v52  ;;  %1495 = vmatpush3.bf16.msra.mxu1 %v1680_v53  ;;  %v1721_v52 = vld [vmem:[#allocation6 + $0x80] sm:$0xff]  }
 0x137   :  { %932 = vmatprep.subr.bf16.mxu0 %v1683_v54  ;;  %1502 = vmatprep.subr.bf16.mxu1 %v1705_v10  ;;  %v1722_v54 = vld [vmem:[#allocation6 + $0x88] sm:$0xff]  }
 0x139   :  { %1030 = vmatmul.mubr.bf16.vlgmr.msra.gmra.mrb[8].mxu1 %v216_v55 }
 0x13a   :  { %933 = vmatpush1.bf16.msra.mxu0 %v1681_v56  ;;  %1503 = vmatpush3.bf16.msra.mxu1 %v1706_v11  ;;  %v1727_v56 = vld [vmem:[#allocation6 + $0xb0] sm:$0xff]  }
 0x13b   :  { %934 = vmatprep.subr.bf16.mxu0 %v1686_v57  ;;  %1504 = vmatprep.subr.bf16.mxu1 %v1707_v12  ;;  %v1728_v57 = vld [vmem:[#allocation6 + $0xb8] sm:$0xff]  }
 0x13e   :  { %935 = vmatpush1.bf16.msra.mxu0 %v1684_v58  ;;  %1505 = vmatpush3.bf16.msra.mxu1 %v1708_v13 }
 0x13f   :  { %936 = vmatprep.subr.bf16.mxu0 %v1689_v61  ;;  %1506 = vmatprep.subr.bf16.mxu1 %v1709_v14 }
 0x142   :  { %937 = vmatpush1.bf16.msra.mxu0 %v1687_v63  ;;  %1507 = vmatpush3.bf16.msra.mxu1 %v1710_v15 }
 0x143   :  { %938 = vmatprep.subr.bf16.mxu0 %v1692_v0  ;;  %1508 = vmatprep.subr.bf16.mxu1 %v1711_v16 }
 0x146   :  { %939 = vmatpush1.bf16.msra.mxu0 %v1690_v1  ;;  %1509 = vmatpush3.bf16.msra.mxu1 %v1712_v17 }
 0x147   :  { %940 = vmatprep.subr.bf16.mxu0 %v1695_v2  ;;  %1510 = vmatprep.subr.bf16.mxu1 %v1713_v18 }
 0x14a   :  { %941 = vmatpush1.bf16.msra.mxu0 %v1693_v3  ;;  %1511 = vmatpush3.bf16.msra.mxu1 %v1714_v19 }
 0x14b   :  { %942 = vmatprep.subr.bf16.mxu0 %v1698_v4  ;;  %1512 = vmatprep.subr.bf16.mxu1 %v1715_v20  ;;  %v1433_v4 = vld [vmem:[%s1935_s6] ss:$0 sm:$0xff] }
 0x14e   :  { %943 = vmatpush1.bf16.msra.mxu0 %v1696_v5  ;;  %1513 = vmatpush3.bf16.msra.mxu1 %v1716_v21 }
 0x14f   :  { %944 = vmatprep.subr.bf16.mxu0 %v1701_v6  ;;  %1514 = vmatprep.subr.bf16.mxu1 %v1717_v22 }
 0x152   :  { %945 = vmatpush1.bf16.msra.mxu0 %v1699_v7  ;;  %1515 = vmatpush3.bf16.msra.mxu1 %v1718_v23 }
 0x153   :  { %946 = vmatprep.subr.bf16.mxu0 %v1704_v8  ;;  %1516 = vmatprep.subr.bf16.mxu1 %v1719_v24 }
 0x156   :  { %947 = vmatpush1.bf16.msra.mxu0 %v1702_v9  ;;  %1517 = vmatpush3.bf16.msra.mxu1 %v1720_v25 }
 0x157   :  { %1533 = vmatprep.subr.bf16.mxu1 %v1809_v26 }
 0x159   :  { %949 = vmatmul.mubr.bf16.vlgmr.msra.gmra.mrb[4].mxu0 %v216_v55  ;;  %v1726_v55 = vld [vmem:[#allocation6 + $0xa8] sm:$0xff]  }
 0x1ec   :  { %v1474_v27 = vpop.f32.mrb[4].mxu1 }
 0x1ed   :  { %v1475_v28 = vpop.f32.mrb[5].mxu1 }
 0x1ee   :  { %v1476_v29 = vadd.f32 %v1475_v28, %v1474_v27  ;;  %v1477_v30 = vpop.f32.mrb[6].mxu1 }
 0x1ef   :  { %v1478_v31 = vpop.f32.mrb[7].mxu1 }
 0x1f0   :  { %v992_v37 = vadd.f32 %v1476_v29, %v359_v33 }
 0x20c   :  { %v1496_v34 = vpop.f32.mrb[8].mxu1 }
 0x20d   :  { %v1497_v35 = vpop.f32.mrb[9].mxu1 }
 0x20e   :  { %v1498_v38 = vadd.f32 %v1497_v35, %v1496_v34  ;;  %v1499_v39 = vpop.f32.mrb[10].mxu1 }
 0x20f   :  { %v1500_v40 = vpop.f32.mrb[11].mxu1 }
 0x210   :  { %v1032_v41 = vadd.f32 %v1498_v38, %v992_v37 }
 0x212   :  { %v1039_v58 = vmax.f32 %v1032_v41, 0.0 }
 0x214   :  { %v1042_v61 = vpack.c.bf16 %v1039_v58, %v1039_v58 }
 0x22c   :  { %v950_v44 = vpop.f32.mrb[4].mxu0 }
 0x22d   :  { %v1553_v45 = vadd.f32 %v950_v44, %v351_v42  ;;  %v952_v46 = vpop.f32.mrb[5].mxu0 }
 0x22e   :  { %v1554_v47 = vadd.f32 %v952_v46, %v355_v43  ;;  %v954_v48 = vpop.f32.mrb[6].mxu0 }
 0x22f   :  { %v1037_v49 = vmax.f32 %v1553_v45, 0.0  ;;  %v955_v36 = vpop.f32.mrb[7].mxu0 }
 0x230   :  { %v1038_v50 = vmax.f32 %v1554_v47, 0.0 }
 0x231   :  { %v1040_v53 = vpack.c.bf16 %v1037_v49, %v1037_v49 }
 0x232   :  { %v1041_v51 = vpack.c.bf16 %v1038_v50, %v1038_v50 }
 0x234   :  { %1274 = vmatprep.mubr.bf16.mxu1 %v1041_v51 }
 0x235   :  { %1275 = vmatmul.mubr.bf16.vlgmr.msra.gmra.mrb[12].mxu1 %v1040_v53 }
 0x236   :  { %1534 = vmatpush3.bf16.msra.mxu1 %v1721_v52  ;;  %1549 = vmatprep.mubr.msk.bf16.mxu1 %vm1810_vm2, %v1809_v26 }
 0x237   :  { %1535 = vmatprep.subr.bf16.mxu1 %v1809_v26 }
 0x23a   :  { %1536 = vmatpush3.bf16.msra.mxu1 %v1722_v54 }
 0x23b   :  { %1537 = vmatprep.subr.bf16.mxu1 %v1809_v26 }
 0x23e   :  { %1538 = vmatpush3.bf16.msra.mxu1 %v1723_v59 }
 0x23f   :  { %1539 = vmatprep.subr.bf16.mxu1 %v1809_v26 }
 0x242   :  { %1540 = vmatpush3.bf16.msra.mxu1 %v1724_v60 }
 0x243   :  { %1541 = vmatprep.subr.bf16.mxu1 %v1809_v26 }
 0x246   :  { %1542 = vmatpush3.bf16.msra.mxu1 %v1725_v62 }
 0x247   :  { %1543 = vmatprep.subr.bf16.mxu1 %v1809_v26 }
 0x24a   :  { %1544 = vmatpush3.bf16.msra.mxu1 %v1726_v55 }
 0x24b   :  { %1545 = vmatprep.subr.bf16.mxu1 %v1809_v26 }
 0x24e   :  { %1546 = vmatpush3.bf16.msra.mxu1 %v1727_v56 }
 0x24f   :  { %1547 = vmatprep.subr.bf16.mxu1 %v1809_v26 }
 0x252   :  { %1548 = vmatpush3.bf16.msra.mxu1 %v1728_v57 }
 0x255   :  { %1550 = vmatmul.mubr.bf16.vlgmr.msra.gmra.mrb[16].mxu1 %v1042_v61 }
 0x308   :  { %v1518_v63 = vpop.f32.mrb[12].mxu1 }
 0x309   :  { %v1519_v0 = vpop.f32.mrb[13].mxu1 }
 0x30a   :  { %v1520_v1 = vadd.f32 %v1519_v0, %v1518_v63  ;;  %v1521_v2 = vpop.f32.mrb[14].mxu1 }
 0x30b   :  { %v1522_v3 = vpop.f32.mrb[15].mxu1 }
 0x30c   :  { %v1277_v5 = vadd.f32 %v1520_v1, %v1433_v4 }
 0x328   :  { %v1316_v6 = vpop.f32.mrb[16].mxu1 }
 0x329   :  { %v1317_v7 = vadd.f32 %v1316_v6, %v1277_v5  ;;  %v1551_v8 = vpop.f32.mrb[17].mxu1 }
 0x32a   :  { %v1319_v9 = vpop.f32.mrb[18].mxu1 }
 0x32b   :  { %1322 = vst [vmem:[%s1936_s7] sm:$0xff] %v1317_v7  ;;  %v1552_v10 = vpop.f32.mrb[19].mxu1 }
 0x32c   :  { %1327 = vsyncpa [#allocation3], 1 }
 0x32d   :  { %1328 = vsyncpa [#allocation5], 1 }

</bundles_post_ra>
